<compile_context>
chip_gen: v7x
topology: tpu7x:2x2x1
jax: 0.10.0
libtpu: 0.0.40
codegen_flags: <defaults>
</compile_context>

<pallas_src>
import functools
import math

import jax
import jax.numpy as jnp
from jax.experimental import pallas as pl
from jax.experimental.pallas import tpu as pltpu


def _round_up(x, m):
    return (x + m - 1) // m * m


# ----------------------------- in-kernel helpers -----------------------------

def _layernorm(x, gamma, beta, eps=1e-5):
    mu = jnp.mean(x, axis=-1, keepdims=True)
    var = jnp.mean((x - mu) ** 2, axis=-1, keepdims=True)
    return (x - mu) * jax.lax.rsqrt(var + eps) * gamma + beta


def _erf(x):
    # Abramowitz & Stegun 7.1.26; reciprocal goes to the EUP slot (approx).
    s = jnp.sign(x)
    ax = jnp.abs(x)
    t = pl.reciprocal(1.0 + 0.3275911 * ax, approx=True)
    poly = ((((1.061405429 * t - 1.453152027) * t + 1.421413741) * t
             - 0.284496736) * t + 0.254829592) * t
    return s * (1.0 - poly * jnp.exp(-ax * ax))


def _gelu_exact(x):
    # GELU(x) = 0.5 * x * (1 + erf(x / sqrt(2)))   (PyTorch nn.GELU default)
    return 0.5 * x * (1.0 + _erf(x * (1.0 / math.sqrt(2.0))))


def _softmax_last(x):
    m = jnp.max(x, axis=-1, keepdims=True)
    e = jnp.exp(x - m)
    return e * pl.reciprocal(jnp.sum(e, axis=-1, keepdims=True), approx=True)


# --------------------------------- kernels -----------------------------------

def linear_kernel(x_ref, w_ref, b_ref, o_ref):
    o_ref[...] = (jnp.dot(x_ref[...], w_ref[...],
                          preferred_element_type=jnp.float32) + b_ref[...])


def linear(x, w, b, *, tile_m=256):
    """y = x @ w + b ; x:(M,K) f32 (cast to bf16), w:(K,N) bf16, b:(N,) f32."""
    M, K = x.shape
    N = w.shape[1]
    tile_m = min(tile_m, _round_up(M, 8))
    Mp = _round_up(M, tile_m)
    if Mp != M:
        x = jnp.pad(x, ((0, Mp - M), (0, 0)))
    out = pl.pallas_call(
        linear_kernel,
        out_shape=jax.ShapeDtypeStruct((Mp, N), jnp.float32),
        grid=(Mp // tile_m,),
        in_specs=[pl.BlockSpec((tile_m, K), lambda i: (i, 0)),
                  pl.BlockSpec((K, N), lambda i: (0, 0)),
                  pl.BlockSpec((1, N), lambda i: (0, 0))],
        out_specs=pl.BlockSpec((tile_m, N), lambda i: (i, 0)),
        compiler_params=pltpu.CompilerParams(
            dimension_semantics=("parallel",)),
    )(x.astype(jnp.bfloat16), w, b.reshape(1, N).astype(jnp.float32))
    return out[:M]


def encoder_kernel(x_ref, ln1g_ref, ln1b_ref, wqkv_ref, wo_ref, bo_ref,
                   ln2g_ref, ln2b_ref, w1_ref, b1_ref, w2_ref, b2_ref,
                   o_ref, z_sc, *, heads, n_valid):
    """One grid step = one (batch element, layer).  Grid = (B, depth)."""
    layer = pl.program_id(1)

    @pl.when(layer == 0)
    def _():
        z_sc[...] = x_ref[0]                          # load activation once

    x = z_sc[...]                                     # (n_pad, dim) f32
    n_pad, dim = x.shape
    bf16 = jnp.bfloat16
    f32 = jnp.float32

    # ---- Residual( PreNorm( Attention ) ) ----
    xn = _layernorm(x, ln1g_ref[0], ln1b_ref[0])
    # Single head-batched contraction for Q, K and V.
    # wqkv_ref block: (3*heads, dim, d_head); index = qkv_idx*heads + head.
    xn_b = jnp.broadcast_to(xn.astype(bf16)[None], (3 * heads, n_pad, dim))
    qkv = jnp.einsum("hnd,hdk->hnk", xn_b, wqkv_ref[0],
                     preferred_element_type=f32)      # (3*heads, n, d_head)
    q = qkv[:heads]
    k = qkv[heads:2 * heads]
    v = qkv[2 * heads:]

    # Q @ K^T batched over heads; K transpose folded into the contraction.
    # NOTE: no 1/sqrt(d_head) scaling -- matches the reference forward().
    s = jnp.einsum("hqd,hkd->hqk", q.astype(bf16), k.astype(bf16),
                   preferred_element_type=f32)        # (heads, n, n)
    if n_valid < n_pad:
        key_idx = jax.lax.broadcasted_iota(jnp.int32, s.shape, 2)
        s = jnp.where(key_idx < n_valid, s, -1e30)    # mask padded keys
    p = _softmax_last(s)
    o = jnp.einsum("hqk,hkd->hqd", p.astype(bf16), v.astype(bf16),
                   preferred_element_type=f32)        # (heads, n, d_head)
    # concat_h(o_h) @ Wo == sum_h o_h @ Wo_h  (no head-concat / transpose)
    proj = jnp.einsum("hnd,hdk->hnk", o.astype(bf16), wo_ref[0],
                      preferred_element_type=f32)     # (heads, n, dim)
    attn = jnp.sum(proj, axis=0) + bo_ref[0]
    x1 = x + attn

    # ---- Residual( PreNorm( Mlp ) ) ----
    xn2 = _layernorm(x1, ln2g_ref[0], ln2b_ref[0])
    h1 = jnp.dot(xn2.astype(bf16), w1_ref[0],
                 preferred_element_type=f32) + b1_ref[0]
    h1 = _gelu_exact(h1)                              # elementwise in f32
    h2 = jnp.dot(h1.astype(bf16), w2_ref[0],
                 preferred_element_type=f32) + b2_ref[0]
    z_sc[...] = x1 + h2

    @pl.when(layer == pl.num_programs(1) - 1)
    def _():
        o_ref[0] = z_sc[...]                          # single HBM writeback


def transformer(z, enc, *, heads, n_valid):
    B, n_pad, dim = z.shape
    depth = enc["wqkv"].shape[0]
    names = ("ln1g", "ln1b", "wqkv", "wo", "bo",
             "ln2g", "ln2b", "w1", "b1", "w2", "b2")
    weights = [enc[k] for k in names]

    def w_spec(arr):
        nd = arr.ndim
        return pl.BlockSpec((1,) + arr.shape[1:],
                            lambda b, l, _nd=nd: (l,) + (0,) * (_nd - 1))

    # Explicit VMEM budget: double-buffered per-layer weight blocks + resident
    # activation blocks + in-kernel temporaries (clamped to 64 MiB for v7x).
    d_head = dim // heads
    mlp_hidden = enc["w1"].shape[-1]
    per_layer_w = sum(int(w.nbytes) // depth for w in weights)
    act = n_pad * dim * 4
    interm = (3 * heads * n_pad * (dim + d_head) * 4
              + 2 * heads * n_pad * n_pad * 4
              + heads * n_pad * dim * 4
              + 2 * n_pad * mlp_hidden * 4)
    vmem_limit = int(min(64 << 20,
                         max(16 << 20, 4 * per_layer_w + 8 * act + 3 * interm)))
    # TODO(synk): at ViT-B scale on v7x (64 MiB VMEM) split attention / MLP into
    # separate kernels or tile mlp_hidden so both weight sets are not resident.

    kernel = functools.partial(encoder_kernel, heads=heads, n_valid=n_valid)
    return pl.pallas_call(
        kernel,
        out_shape=jax.ShapeDtypeStruct((B, n_pad, dim), jnp.float32),
        grid=(B, depth),
        in_specs=[pl.BlockSpec((1, n_pad, dim), lambda b, l: (b, 0, 0))]
                 + [w_spec(w) for w in weights],
        out_specs=pl.BlockSpec((1, n_pad, dim), lambda b, l: (b, 0, 0)),
        scratch_shapes=[pltpu.VMEM((n_pad, dim), jnp.float32)],
        compiler_params=pltpu.CompilerParams(
            dimension_semantics=("parallel", "arbitrary"),
            vmem_limit_bytes=vmem_limit),
    )(z, *weights)


def head_kernel(x_ref, g_ref, b_ref, w_ref, bias_ref, o_ref):
    xn = _layernorm(x_ref[...], g_ref[...], b_ref[...])
    o_ref[...] = (jnp.dot(xn.astype(jnp.bfloat16), w_ref[...],
                          preferred_element_type=jnp.float32) + bias_ref[...])


def mlp_head(x, gamma, beta, w, bias):
    B, dim = x.shape
    n_classes = w.shape[1]
    return pl.pallas_call(
        head_kernel,
        out_shape=jax.ShapeDtypeStruct((B, n_classes), jnp.float32),
    )(x, gamma.reshape(1, dim), beta.reshape(1, dim), w,
      bias.reshape(1, n_classes))


# ------------------------------- ViT forward ----------------------------------

def vit_forward(x, params, *, patch_size, heads):
    B, C, H, W = x.shape
    P = patch_size
    hp, wp = H // P, W // P
    dim = params["patch_w"].shape[1]

    # host glue: 'b c (h p1) (w p2) -> b (h w) (p1 p2 c)'
    patches = (x.reshape(B, C, hp, P, wp, P)
                .transpose(0, 2, 4, 3, 5, 1)
                .reshape(B, hp * wp, P * P * C))

    emb = linear(patches.reshape(B * hp * wp, P * P * C),
                 params["patch_w"], params["patch_b"]).reshape(B, hp * wp, dim)

    cls = jnp.broadcast_to(params["cls_token"], (B, 1, dim)).astype(jnp.float32)
    z = jnp.concatenate([cls, emb], axis=1)
    n = hp * wp + 1
    z = z + params["pos_embedding"][:, :n]

    # Pad sequence to a sublane multiple; padded keys masked in-kernel.
    n_pad = _round_up(n, 8)
    if n_pad != n:
        z = jnp.pad(z, ((0, 0), (0, n_pad - n), (0, 0)))

    z = transformer(z, params["encoder"], heads=heads, n_valid=n)

    cls_out = z[:, 0]                                 # (B, dim), cls token
    return mlp_head(cls_out, params["head_g"], params["head_b"],
                    params["head_w"], params["head_bias"])


# ------------------------------ parameter init ---------------------------------

def init_params(key, *, image_size, patch_size, n_classes, depth, dim, heads,
                mlp_hidden):
    num_patches = (image_size // patch_size) ** 2
    patch_dim = 3 * patch_size ** 2
    d_head = dim // heads

    def nrm(k, shape, scale=0.02):
        return (scale * jax.random.normal(k, shape)).astype(jnp.float32)

    keys = iter(jax.random.split(key, 8 + depth * 4))

    params = {
        "patch_w": nrm(next(keys), (patch_dim, dim)).astype(jnp.bfloat16),
        "patch_b": jnp.zeros((dim,), jnp.float32),
        "pos_embedding": jax.random.normal(next(keys), (1, num_patches + 1, dim),
                                           jnp.float32),
        "cls_token": jax.random.normal(next(keys), (1, 1, dim), jnp.float32),
        "head_g": jnp.ones((dim,), jnp.float32),
        "head_b": jnp.zeros((dim,), jnp.float32),
        "head_w": nrm(next(keys), (dim, n_classes)).astype(jnp.bfloat16),
        "head_bias": jnp.zeros((n_classes,), jnp.float32),
    }

    wqkv_l, wo_l, w1_l, w2_l = [], [], [], []
    for _ in range(depth):
        wqkv = nrm(next(keys), (dim, 3 * dim))   # packed [Q | K | V] columns
        wo = nrm(next(keys), (dim, dim))
        w1 = nrm(next(keys), (dim, mlp_hidden))
        w2 = nrm(next(keys), (mlp_hidden, dim))
        # Host-side re-layout equivalent to chunk(3) + 'b n (h d) -> b h n d':
        # (dim, 3*dim) -> (3*heads, dim, d_head), index = qkv_idx*heads + head.
        per = (wqkv.reshape(dim, 3, heads, d_head)
                    .transpose(1, 2, 0, 3)
                    .reshape(3 * heads, dim, d_head))
        wqkv_l.append(per)
        # concat_h(o_h) @ Wo == sum_h o_h @ Wo[h*d_head:(h+1)*d_head, :]
        wo_l.append(wo.reshape(heads, d_head, dim))
        w1_l.append(w1)
        w2_l.append(w2)

    params["encoder"] = {
        "ln1g": jnp.ones((depth, 1, dim), jnp.float32),
        "ln1b": jnp.zeros((depth, 1, dim), jnp.float32),
        "wqkv": jnp.stack(wqkv_l).astype(jnp.bfloat16),   # (depth, 3h, dim, dh)
        "wo": jnp.stack(wo_l).astype(jnp.bfloat16),       # (depth, h, dh, dim)
        "bo": jnp.zeros((depth, 1, dim), jnp.float32),
        "ln2g": jnp.ones((depth, 1, dim), jnp.float32),
        "ln2b": jnp.zeros((depth, 1, dim), jnp.float32),
        "w1": jnp.stack(w1_l).astype(jnp.bfloat16),       # (depth, dim, mlp)
        "b1": jnp.zeros((depth, 1, mlp_hidden), jnp.float32),
        "w2": jnp.stack(w2_l).astype(jnp.bfloat16),       # (depth, mlp, dim)
        "b2": jnp.zeros((depth, 1, dim), jnp.float32),
    }
    return params


# ----------------------------------- main --------------------------------------

if __name__ == "__main__":
    # Small, aligned ViT configuration consistent with the module's forward.
    IMAGE_SIZE = 16
    PATCH_SIZE = 8      # -> 4 patches, seq = 5 (padded to 8 in the encoder)
    N_CLASSES = 10
    DEPTH = 2
    DIM = 128           # multiple of 128 -> lane-dense tiles
    HEADS = 4           # d_head = 32
    MLP_HIDDEN = 256
    BATCH = 2

    key = jax.random.PRNGKey(0)
    k_params, k_x = jax.random.split(key)

    params = init_params(k_params, image_size=IMAGE_SIZE, patch_size=PATCH_SIZE,
                         n_classes=N_CLASSES, depth=DEPTH, dim=DIM, heads=HEADS,
                         mlp_hidden=MLP_HIDDEN)

    # layout: NCHW input (PyTorch convention)
    x = jax.random.normal(k_x, (BATCH, 3, IMAGE_SIZE, IMAGE_SIZE), jnp.float32)

    logits = vit_forward(x, params, patch_size=PATCH_SIZE, heads=HEADS)
    logits = jax.block_until_ready(logits)

    assert logits.shape == (BATCH, N_CLASSES), logits.shape
    assert jnp.all(jnp.isfinite(logits))
    print("KERNEL_OK")
</pallas_src>

<mosaic_0001>
module attributes {stable_mosaic.version = 11 : i64} {
  func.func @linear_kernel(%arg0: i32, %arg1: memref<8x192xbf16, #tpu.memory_space<vmem>>, %arg2: memref<192x128xbf16, #tpu.memory_space<vmem>>, %arg3: memref<1x128xf32, #tpu.memory_space<vmem>>, %arg4: memref<8x128xf32, #tpu.memory_space<vmem>>) attributes {dimension_semantics = [#tpu.dimension_semantics<parallel>], iteration_bounds = array<i64: 1>, scalar_prefetch = 0 : i64, scratch_operands = 0 : i64, tpu.core_type = #tpu.core_type<tc>, window_params = [{transform_indices = @transform_0, window_bounds = array<i64: 8, 192>}, {pipeline_mode = #tpu.pipeline_mode<synchronous>, transform_indices = @transform_1, window_bounds = array<i64: 192, 128>}, {pipeline_mode = #tpu.pipeline_mode<synchronous>, transform_indices = @transform_2, window_bounds = array<i64: 1, 128>}, {transform_indices = @transform_3, window_bounds = array<i64: 8, 128>}]} {
    %c0 = arith.constant 0 : index
    %c0_0 = arith.constant 0 : index
    %0 = vector.load %arg1[%c0, %c0_0] : memref<8x192xbf16, #tpu.memory_space<vmem>>, vector<8x192xbf16>
    %c0_1 = arith.constant 0 : index
    %c0_2 = arith.constant 0 : index
    %1 = vector.load %arg2[%c0_1, %c0_2] : memref<192x128xbf16, #tpu.memory_space<vmem>>, vector<192x128xbf16>
    %cst = arith.constant dense<0.000000e+00> : vector<8x128xf32>
    %2 = tpu.matmul %0, %1, %cst {dimension_numbers = #tpu.dot_dimension_numbers<[1], [0], [0], [1], [0, 0, 1, 1], [], []>} : vector<8x192xbf16>, vector<192x128xbf16>, vector<8x128xf32> -> vector<8x128xf32>
    %c0_3 = arith.constant 0 : index
    %c0_4 = arith.constant 0 : index
    %3 = vector.load %arg3[%c0_3, %c0_4] : memref<1x128xf32, #tpu.memory_space<vmem>>, vector<1x128xf32>
    %4 = vector.broadcast %3 : vector<1x128xf32> to vector<8x128xf32>
    %5 = arith.addf %2, %4 : vector<8x128xf32>
    %c0_5 = arith.constant 0 : index
    %c0_6 = arith.constant 0 : index
    %6 = vector.load %arg4[%c0_5, %c0_6] : memref<8x128xf32, #tpu.memory_space<vmem>>, vector<8x128xf32>
    tpu.vector_store %arg4[%c0_5, %c0_6], %5 {strides = array<i32>} : memref<8x128xf32, #tpu.memory_space<vmem>>, vector<8x128xf32>,
    return
  }
  func.func @transform_0(%arg0: i32) -> (i32, i32) {
    %c0_i32 = arith.constant 0 : i32
    %c0_i32_0 = arith.constant 0 : i32
    return %arg0, %c0_i32 : i32, i32
  }
  func.func @transform_1(%arg0: i32) -> (i32, i32) {
    %c0_i32 = arith.constant 0 : i32
    %c0_i32_0 = arith.constant 0 : i32
    %c0_i32_1 = arith.constant 0 : i32
    return %c0_i32, %c0_i32_0 : i32, i32
  }
  func.func @transform_2(%arg0: i32) -> (i32, i32) {
    %c0_i32 = arith.constant 0 : i32
    %c0_i32_0 = arith.constant 0 : i32
    %c0_i32_1 = arith.constant 0 : i32
    return %c0_i32, %c0_i32_0 : i32, i32
  }
  func.func @transform_3(%arg0: i32) -> (i32, i32) {
    %c0_i32 = arith.constant 0 : i32
    %c0_i32_0 = arith.constant 0 : i32
    return %arg0, %c0_i32 : i32, i32
  }
}

</mosaic_0001>

<bundles_post_ra>
// kernel: tpu_custom_call.1
= control target key start
LH: loop header
LB: loop body
LE: loop exit
PB: predicated region body
PF: predicated region fallthrough
CT: control target
= control target key end

     0   :  { %8 = vsyncpa [#allocation3], 0  ;;  %s393_s0 = inlined_call_operand.hbm [shape: bf16[8,192], index: 0, kind: input, shape index: {}]   ;;  %s394_s1 = inlined_call_operand.hbm [shape: bf16[192,128], index: 1, kind: input, shape index: {}]   ;;  %s395_s2 = inlined_call_operand.vmem [shape: f32[1,128], index: 2, kind: input, shape index: {}]   ;;  %s396_s3 = inlined_call_operand.hbm [shape: f32[8,128], index: 3, kind: output, shape index: {}]  }
   0x1   :  { %9 = vsyncpa [#allocation6], 0 }
   0x2   :  { %10 = vsyncpa [#allocation4], 0  ;;  %s321_s12 = smov [#allocation2]   ;;  %s322_s14 = smov [#allocation5]  }
   0x3   :  { %s17_s13 = sshll.u32 %s321_s12, 4  ;;  %s26_s15 = sshll.u32 %s322_s14, 4  ;;  %s18_s13 = int_to_ptr.vmem [resolvable:$true] %s17_s13  ;;  %s347_s15 = int_to_ptr.vmem [resolvable:$true] %s26_s15 }
   0x4   :  { %s249_s18 = scalar_lea.hbm %s393_s0, 128 }
   0x5   :  { %p250_p0 = scmp.ne.s32.totalorder %s393_s0, %s249_s18  ;;  %p253_p1 = scmp.lt.u32.totalorder %s249_s18, %s393_s0 }
   0x7   :  { %p255_p2 = pnand %p253_p1, %p250_p0 }
   0x9   :  { %258 = shalt.err (!%p255_p2)
}
   0xa   :  { %s259_s23 = scalar_lea.vmem %s18_s13, 128  ;;  %p264_p4 = scmp.lt.s32.totalorder %s18_s13, %s18_s13 }
   0xb   :  { %p260_p3 = scmp.ne.s32.totalorder %s18_s13, %s259_s23  ;;  %p265_p5 = scmp.lt.s32.totalorder %s259_s23, %s259_s23 }
   0xd   :  { %p266_p6 = por %p265_p5, %p264_p4 }
   0xf   :  { %p267_p7 = pnand %p266_p6, %p260_p3 }
  0x11   :  { %270 = shalt.err (!%p267_p7)
}
  0x12   :  { %20 = dma.hbm_to_vmem [thread:$0]  %s393_s0, 128, %s18_s13, [#allocation3]  }
  0x13   :  { %s271_s28 = scalar_lea.hbm %s394_s1, 1536 }
  0x14   :  { %p272_p8 = scmp.ne.s32.totalorder %s394_s1, %s271_s28  ;;  %p275_p9 = scmp.lt.u32.totalorder %s271_s28, %s394_s1 }
  0x16   :  { %p277_p10 = pnand %p275_p9, %p272_p8 }
  0x18   :  { %280 = shalt.err (!%p277_p10)
}
  0x19   :  { %s281_s6 = scalar_lea.vmem %s347_s15, 1536  ;;  %p286_p12 = scmp.lt.s32.totalorder %s347_s15, %s347_s15 }
  0x1a   :  { %p282_p11 = scmp.ne.s32.totalorder %s347_s15, %s281_s6  ;;  %p287_p13 = scmp.lt.s32.totalorder %s281_s6, %s281_s6 }
  0x1c   :  { %p288_p0 = por %p287_p13, %p286_p12 }
  0x1e   :  { %p289_p1 = pnand %p288_p0, %p282_p11 }
  0x20   :  { %292 = shalt.err (!%p289_p1)
}
  0x21   :  { %s323_s0 = smov 64   ;;  %s324_s7 = smov 4  }
  0x22   :  { %32 = dma.hbm_to_vmem [thread:$0]  %s394_s1, 1536, %s347_s15, [#allocation6], %s323_s0, %s323_s0, %s324_s7  }
  0x23   :  { %315 = dma.done.wait [#allocation3], 128  }
  0x24   :  { %316 = vsyncadd [#allocation3], 4294967168 }
  0x25   :  { %317 = dma.done.wait [#allocation6], 1536  }
  0x26   :  { %318 = vsyncadd [#allocation6], 4294965760  ;;  %v325_v0 = vmov 0   ;;  %v235_v1 = vld [vmem:[#allocation5] sm:$0xff]   ;;  %v236_v2 = vld [vmem:[#allocation5 + $0x8] sm:$0xff]   ;;  %vm152_vm0 = vcmask 523264  }
  0x27   :  { %156 = vmatprep.subr.bf16.mxu0 %v325_v0  ;;  %v237_v3 = vld [vmem:[#allocation5 + $0x10] sm:$0xff]   ;;  %v238_v4 = vld [vmem:[#allocation5 + $0x18] sm:$0xff]   ;;  %v239_v7 = vld [vmem:[#allocation5 + $0x20] sm:$0xff]   ;;  %s326_s11 = smov [#allocation7]  }
  0x28   :  { %157 = vmatpush1.bf16.msra.mxu0 %v235_v1  ;;  %v42_v5 = vld [vmem:[#allocation2] sm:$0xff]  ;;  %v240_v8 = vld [vmem:[#allocation5 + $0x28] sm:$0xff]   ;;  %v241_v9 = vld [vmem:[#allocation5 + $0x30] sm:$0xff]   ;;  %s203_s12 = sshll.u32 %s326_s11, 4  ;;  %s204_s12 = int_to_ptr.vmem [resolvable:$true] %s203_s12 }
  0x29   :  { %158 = vmatprep.subr.bf16.mxu0 %v325_v0  ;;  %v215_v6 = vcombine.high %v42_v5, %v42_v5  ;;  %v242_v10 = vld [vmem:[#allocation5 + $0x38] sm:$0xff]   ;;  %v243_v11 = vld [vmem:[#allocation5 + $0x40] sm:$0xff]   ;;  %v244_v12 = vld [vmem:[#allocation5 + $0x48] sm:$0xff]   ;;  %v214_v15 = vcombine.low %v42_v5, %v42_v5  ;;  %s293_s13 = scalar_lea.vmem %s204_s12, 128  ;;  %p298_p3 = scmp.lt.s32.totalorder %s204_s12, %s204_s12 }
  0x2a   :  { %v245_v13 = vld [vmem:[#allocation5 + $0x50] sm:$0xff]   ;;  %v246_v14 = vld [vmem:[#allocation5 + $0x58] sm:$0xff]   ;;  %p294_p2 = scmp.ne.s32.totalorder %s204_s12, %s293_s13  ;;  %p299_p4 = scmp.lt.s32.totalorder %s293_s13, %s293_s13 }
  0x2b   :  { %228 = vmatprep.mubr.msk.bf16.mxu0 %vm152_vm0, %v215_v6  ;;  %v213_v16 = vld [vmem:[%s395_s2] ss:$0 sm:$0xff] }
  0x2c   :  { %159 = vmatpush1.bf16.msra.mxu0 %v236_v2  ;;  %p300_p5 = por %p299_p4, %p298_p3 }
  0x2d   :  { %160 = vmatprep.subr.bf16.mxu0 %v325_v0 }
  0x2e   :  { %p301_p6 = pnand %p300_p5, %p294_p2 }
  0x30   :  { %161 = vmatpush1.bf16.msra.mxu0 %v237_v3 }
  0x31   :  { %162 = vmatprep.subr.bf16.mxu0 %v325_v0 }
  0x34   :  { %163 = vmatpush1.bf16.msra.mxu0 %v238_v4 }
  0x35   :  { %164 = vmatprep.subr.bf16.mxu0 %v325_v0 }
  0x38   :  { %165 = vmatpush1.bf16.msra.mxu0 %v239_v7 }
  0x39   :  { %166 = vmatprep.subr.bf16.mxu0 %v325_v0 }
  0x3c   :  { %167 = vmatpush1.bf16.msra.mxu0 %v240_v8 }
  0x3d   :  { %168 = vmatprep.subr.bf16.mxu0 %v325_v0 }
  0x40   :  { %169 = vmatpush1.bf16.msra.mxu0 %v241_v9 }
  0x41   :  { %170 = vmatprep.subr.bf16.mxu0 %v325_v0 }
  0x44   :  { %171 = vmatpush1.bf16.msra.mxu0 %v242_v10 }
  0x45   :  { %172 = vmatprep.subr.bf16.mxu0 %v325_v0 }
  0x48   :  { %173 = vmatpush1.bf16.msra.mxu0 %v243_v11 }
  0x49   :  { %174 = vmatprep.subr.bf16.mxu0 %v325_v0 }
  0x4c   :  { %175 = vmatpush1.bf16.msra.mxu0 %v244_v12 }
  0x4d   :  { %176 = vmatprep.subr.bf16.mxu0 %v325_v0 }
  0x50   :  { %177 = vmatpush1.bf16.msra.mxu0 %v245_v13 }
  0x51   :  { %178 = vmatprep.subr.bf16.mxu0 %v325_v0 }
  0x54   :  { %179 = vmatpush1.bf16.msra.mxu0 %v246_v14 }
  0x57   :  { %189 = vmatmul.mubr.bf16.vlgmr.msra.gmra.mrb[0].mxu0 %v214_v15 }
 0x12a   :  { %v190_v17 = vpop.f32.mrb[0].mxu0 }
 0x12b   :  { %v191_v18 = vadd.f32 %v213_v16, %v190_v17  ;;  %v192_v19 = vpop.f32.mrb[1].mxu0 }
 0x12c   :  { %v193_v20 = vpop.f32.mrb[2].mxu0 }
 0x12d   :  { %196 = vst [vmem:[#allocation7] sm:$0xff] %v191_v18  ;;  %v194_v21 = vpop.f32.mrb[3].mxu0 }
 0x12e   :  { %304 = shalt.err (!%p301_p6)
}
 0x12f   :  { %s305_s2 = scalar_lea.hbm %s396_s3, 128 }
 0x130   :  { %p306_p7 = scmp.ne.s32.totalorder %s396_s3, %s305_s2  ;;  %p309_p8 = scmp.lt.u32.totalorder %s305_s2, %s396_s3 }
 0x132   :  { %p311_p9 = pnand %p309_p8, %p306_p7 }
 0x134   :  { %314 = shalt.err (!%p311_p9)
}
 0x135   :  { %206 = dma.vmem_to_hbm [thread:$0]  %s204_s12, 128, %s396_s3, [#allocation4]  }
 0x136   :  { %319 = dma.done.wait [#allocation4], 128  }
 0x137   :  { %320 = vsyncadd [#allocation4], 4294967168 }
 0x138   :  { %210 = vsyncpa [#allocation3], 1 }
 0x139   :  { %211 = vsyncpa [#allocation6], 1 }
 0x13a   :  { %212 = vsyncpa [#allocation4], 1 }

</bundles_post_ra>
